<compile_context>
chip_gen: v7x
topology: tpu7x:2x2x1
jax: 0.10.0
libtpu: 0.0.40
codegen_flags: <defaults>
</compile_context>

<pallas_src>
import jax
import jax.numpy as jnp
from jax import lax
from jax.experimental import pallas as pl
from jax.experimental.pallas import tpu as pltpu

NUM_GROUPS = 32
EPS = 1e-6
STATS_LANES = 128  # lane-replicated online-softmax stats (unmasked VMEM loads/stores)


# --------------------------------------- helpers ----------------------------------------------

def _vmem_capacity_bytes():
    """Physical VMEM per core; conservative 64 MiB fallback if the query is unavailable."""
    try:
        cap = getattr(pltpu.get_tpu_info(), "vmem_capacity_bytes", None)
        if cap:
            return int(cap)
    except Exception:
        pass
    return 64 * 1024 * 1024


def _pick_tile(hw, max_tile):
    """Largest 16-aligned divisor of hw that is <= max_tile (or hw itself when it already fits)."""
    if hw <= max_tile:
        return hw
    start = max_tile - (max_tile % 16)
    for t in range(start, 15, -16):
        if hw % t == 0:
            return t
    raise ValueError(
        f"H*W={hw} has no 16-aligned tile <= {max_tile}; pad the spatial dims before calling.")


def _kv_resident_fits(hw, c, tq, vmem_limit):
    """Conservative per-step VMEM estimate for keeping the full K/V resident (TK == HW)."""
    kv = 2 * (2 * hw * c * 2)                       # K + V bf16 blocks, double-buffered
    stream = 2 * tq * c * (2 + 4 + 4)               # q bf16 + x f32 + out f32, double-buffered
    scratch = tq * c * 4 + 2 * tq * STATS_LANES * 4  # acc + m/l
    temps = tq * hw * (4 + 2)                       # scores f32 + probs bf16
    return kv + stream + scratch + temps <= int(0.7 * vmem_limit)


# ------------------------- Kernel 1: GroupNorm apply + fused QKV projection -------------------

def _gn_apply_qkv(x_ref, scale_ref, bias_ref, wqkv_ref):
    """GN apply (scale only; shift folded into bias) + fused QKV matmul -> (T, 3C) f32."""
    h = (x_ref[0] * scale_ref[0]).astype(jnp.bfloat16)                  # (T, C) bf16
    return jnp.dot(h, wqkv_ref[...],
                   preferred_element_type=jnp.float32) + bias_ref[0]    # (T, 3C) f32


def _gn_qkv_fused_kernel(x_ref, scale_ref, bias_ref, wqkv_ref, qkv_ref):
    # Single lane-dense bf16 store over 3C lanes.
    qkv_ref[0] = _gn_apply_qkv(x_ref, scale_ref, bias_ref, wqkv_ref).astype(jnp.bfloat16)


def _gn_qkv_split_kernel(x_ref, scale_ref, bias_ref, wqkv_ref, q_ref, k_ref, v_ref):
    # Fallback when C % 128 != 0 (column-blocked reads of a fused slab would be lane-misaligned).
    qkv = _gn_apply_qkv(x_ref, scale_ref, bias_ref, wqkv_ref)
    C = q_ref.shape[-1]
    q_ref[0] = qkv[:, :C].astype(jnp.bfloat16)
    k_ref[0] = qkv[:, C:2 * C].astype(jnp.bfloat16)
    v_ref[0] = qkv[:, 2 * C:].astype(jnp.bfloat16)


# ------------------- Kernel 2: flash attention (online softmax) + residual --------------------

def _flash_attn_residual_kernel(x_ref, q_ref, k_ref, v_ref, o_ref, m_sc, l_sc, acc_sc):
    ki = pl.program_id(2)

    @pl.when(ki == 0)
    def _():
        m_sc[...] = jnp.full(m_sc.shape, -jnp.inf, m_sc.dtype)
        l_sc[...] = jnp.zeros(l_sc.shape, l_sc.dtype)
        acc_sc[...] = jnp.zeros(acc_sc.shape, acc_sc.dtype)

    q = q_ref[0]                                          # (TQ, C) bf16, already * C^-0.5
    k = k_ref[0]                                          # (TK, C) bf16
    v = v_ref[0]                                          # (TK, C) bf16

    # scores: contract last dim of both operands (no k transpose materialized).
    s = lax.dot_general(q, k, (((1,), (1,)), ((), ())),
                        preferred_element_type=jnp.float32)             # (TQ, TK) f32

    # Stats live lane-replicated in (TQ, 128); reduce back to per-row columns for the math.
    m_prev = jnp.max(m_sc[...], axis=-1, keepdims=True)                 # (TQ, 1)
    l_prev = jnp.max(l_sc[...], axis=-1, keepdims=True)                 # (TQ, 1)

    m_new = jnp.maximum(m_prev, jnp.max(s, axis=-1, keepdims=True))
    alpha = jnp.exp(m_prev - m_new)                                     # rescale old state
    p = jnp.exp(s - m_new)                                              # (TQ, TK) f32
    l_new = alpha * l_prev + jnp.sum(p, axis=-1, keepdims=True)
    acc_new = alpha * acc_sc[...] + jnp.dot(p.astype(jnp.bfloat16), v,
                                            preferred_element_type=jnp.float32)

    m_sc[...] = jnp.broadcast_to(m_new, m_sc.shape)
    l_sc[...] = jnp.broadcast_to(l_new, l_sc.shape)
    acc_sc[...] = acc_new

    @pl.when(ki == pl.num_programs(2) - 1)
    def _():
        # approx reciprocal runs on the EUP; ~2^-12 rel error (use approx=False if tighter needed)
        inv_l = pl.reciprocal(l_new, approx=True)
        o_ref[0] = (x_ref[0] + acc_new * inv_l).astype(o_ref.dtype)


# ------------------------------------------ wrapper -------------------------------------------

def nonlocal_block(x_nchw, params, *, max_tile=None):
    """x_nchw: (B, C, H, W) float32.  Returns (B, C, H, W)."""
    B, C, H, W = x_nchw.shape
    HW = H * W
    G = NUM_GROUPS
    assert C % G == 0, "channels must be divisible by 32 groups"

    vmem_cap = _vmem_capacity_bytes()
    vmem_limit = int(vmem_cap * 0.85)
    if max_tile is None:
        max_tile = 512 if vmem_cap <= 80 * 1024 * 1024 else 1024   # v7x vs v5e/v6e

    # NCHW -> (B, HW, C) once; reused as kernel-1 input and kernel-2 residual.
    x_bhwc = jnp.transpose(x_nchw.astype(jnp.float32), (0, 2, 3, 1)).reshape(B, HW, C)

    # ---- GroupNorm statistics: tiny pre-pass, f32, two-pass variance (no cancellation) ----
    xg = x_nchw.astype(jnp.float32).reshape(B, G, (C // G) * HW)
    mean_g = jnp.mean(xg, axis=2)                                   # (B, G)
    var_g = jnp.maximum(jnp.var(xg, axis=2), 0.0)                   # (B, G), clamped
    gamma = params["gamma"].astype(jnp.float32)                     # (C,)
    beta = params["beta"].astype(jnp.float32)
    rep = C // G
    mean_c = jnp.repeat(mean_g, rep, axis=1)                        # (B, C)
    inv_c = jnp.repeat(lax.rsqrt(var_g + EPS), rep, axis=1)         # (B, C)
    scale_c = inv_c * gamma[None, :]                                # (B, C)
    bias_c = beta[None, :] - mean_c * scale_c                       # (B, C)

    # ---- fused, pre-transposed QKV weights; attention scale C^-0.5 folded into q ----
    attn_scale = float(C) ** (-0.5)
    wq_t = (params["wq"].astype(jnp.float32) * attn_scale).T        # (C, C)
    wk_t = params["wk"].astype(jnp.float32).T
    wv_t = params["wv"].astype(jnp.float32).T
    wqkv_f32 = jnp.concatenate([wq_t, wk_t, wv_t], axis=1)          # (C, 3C)
    bqkv = jnp.concatenate([params["bq"].astype(jnp.float32) * attn_scale,
                            params["bk"].astype(jnp.float32),
                            params["bv"].astype(jnp.float32)])      # (3C,)
    # Fold the GroupNorm shift into an effective per-batch QKV bias -> kernel does h = x*scale_c.
    bqkv_eff = (bqkv[None, :] + bias_c @ wqkv_f32).reshape(B, 1, 3 * C)   # (B, 1, 3C) f32
    wqkv = wqkv_f32.astype(jnp.bfloat16)                            # (C, 3C) bf16
    scale_c = scale_c.reshape(B, 1, C)

    T1 = _pick_tile(HW, max_tile)
    fused_qkv = (C % 128 == 0)

    gn_in_specs = [
        pl.BlockSpec((1, T1, C), lambda b, t: (b, t, 0)),           # x
        pl.BlockSpec((1, 1, C), lambda b, t: (b, 0, 0)),            # scale_c
        pl.BlockSpec((1, 1, 3 * C), lambda b, t: (b, 0, 0)),        # effective QKV bias
        pl.BlockSpec((C, 3 * C), lambda b, t: (0, 0)),              # wqkv (bf16, stays resident)
    ]
    cp1 = pltpu.CompilerParams(dimension_semantics=("parallel", "parallel"),
                               vmem_limit_bytes=vmem_limit)

    # ---- kernel 1: GroupNorm apply + fused QKV, tiled over HW ----
    if fused_qkv:
        qkv = pl.pallas_call(
            _gn_qkv_fused_kernel,
            out_shape=jax.ShapeDtypeStruct((B, HW, 3 * C), jnp.bfloat16),
            grid_spec=pltpu.PrefetchScalarGridSpec(
                num_scalar_prefetch=0, grid=(B, HW // T1),
                in_specs=gn_in_specs,
                out_specs=pl.BlockSpec((1, T1, 3 * C), lambda b, t: (b, t, 0))),
            compiler_params=cp1,
        )(x_bhwc, scale_c, bqkv_eff, wqkv)
        q_arr = k_arr = v_arr = qkv
        q_col, k_col, v_col = 0, 1, 2        # column *block* indices into the (.., 3C) slab
    else:
        q_arr, k_arr, v_arr = pl.pallas_call(
            _gn_qkv_split_kernel,
            out_shape=tuple(jax.ShapeDtypeStruct((B, HW, C), jnp.bfloat16) for _ in range(3)),
            grid_spec=pltpu.PrefetchScalarGridSpec(
                num_scalar_prefetch=0, grid=(B, HW // T1),
                in_specs=gn_in_specs,
                out_specs=[pl.BlockSpec((1, T1, C), lambda b, t: (b, t, 0)) for _ in range(3)]),
            compiler_params=cp1,
        )(x_bhwc, scale_c, bqkv_eff, wqkv)
        q_col = k_col = v_col = 0

    # ---- kernel 2: flash attention + residual ----
    TQ = T1
    kv_resident = _kv_resident_fits(HW, C, TQ, vmem_limit)
    TK = HW if kv_resident else _pick_tile(HW, max_tile)

    q_spec = pl.BlockSpec((1, TQ, C), lambda b, qi, ki: (b, qi, q_col))
    if TK < HW:
        # streaming K/V: triple-buffer to hide per-step DMA jitter (feedback for v6e)
        k_spec = pl.BlockSpec((1, TK, C), lambda b, qi, ki: (b, ki, k_col),
                              pipeline_mode=pl.Buffered(3))
        v_spec = pl.BlockSpec((1, TK, C), lambda b, qi, ki: (b, ki, v_col),
                              pipeline_mode=pl.Buffered(3))
    else:
        # K/V resident: block index is constant across qi, so they are fetched once per batch elt
        k_spec = pl.BlockSpec((1, TK, C), lambda b, qi, ki: (b, ki, k_col))
        v_spec = pl.BlockSpec((1, TK, C), lambda b, qi, ki: (b, ki, v_col))

    out = pl.pallas_call(
        _flash_attn_residual_kernel,
        out_shape=jax.ShapeDtypeStruct((B, HW, C), jnp.float32),
        grid_spec=pltpu.PrefetchScalarGridSpec(
            num_scalar_prefetch=0,
            grid=(B, HW // TQ, HW // TK),
            in_specs=[
                pl.BlockSpec((1, TQ, C), lambda b, qi, ki: (b, qi, 0)),   # x (residual)
                q_spec, k_spec, v_spec,
            ],
            out_specs=pl.BlockSpec((1, TQ, C), lambda b, qi, ki: (b, qi, 0)),
            scratch_shapes=[
                pltpu.VMEM((TQ, STATS_LANES), jnp.float32),   # running max (lane-replicated)
                pltpu.VMEM((TQ, STATS_LANES), jnp.float32),   # running sum (lane-replicated)
                pltpu.VMEM((TQ, C), jnp.float32),             # output accumulator
            ]),
        compiler_params=pltpu.CompilerParams(
            dimension_semantics=("parallel", "parallel", "arbitrary"),
            vmem_limit_bytes=vmem_limit),
    )(x_bhwc, q_arr, k_arr, v_arr)

    # (B, HW, C) -> NCHW
    return jnp.transpose(out.reshape(B, H, W, C), (0, 3, 1, 2)).astype(x_nchw.dtype)


# ---------------------------------------- reference -------------------------------------------

def nonlocal_block_ref(x_nchw, params):
    """Pure-JAX (f32) reference matching the PyTorch forward."""
    B, C, H, W = x_nchw.shape
    G = NUM_GROUPS
    xg = x_nchw.reshape(B, G, C // G, H, W)
    mean = xg.mean(axis=(2, 3, 4), keepdims=True)
    var = xg.var(axis=(2, 3, 4), keepdims=True)
    h_ = ((xg - mean) / jnp.sqrt(var + EPS)).reshape(B, C, H, W)
    h_ = h_ * params["gamma"][None, :, None, None] + params["beta"][None, :, None, None]

    def conv1x1(t, w, b):
        return jnp.einsum("bchw,dc->bdhw", t, w) + b[None, :, None, None]

    q = conv1x1(h_, params["wq"], params["bq"]).reshape(B, C, H * W)
    k = conv1x1(h_, params["wk"], params["bk"]).reshape(B, C, H * W)
    v = conv1x1(h_, params["wv"], params["bv"]).reshape(B, C, H * W)
    q = jnp.transpose(q, (0, 2, 1))                       # (B, HW, C)
    attn = jnp.einsum("bqc,bck->bqk", q, k) * (int(C) ** (-0.5))
    attn = jax.nn.softmax(attn, axis=2)
    attn = jnp.transpose(attn, (0, 2, 1))                 # (B, k, q)
    A = jnp.einsum("bck,bkq->bcq", v, attn).reshape(B, C, H, W)
    return x_nchw + A


if __name__ == "__main__":
    key = jax.random.PRNGKey(0)
    # C must be divisible by 32 (groups); C=128 also exercises the fused lane-dense QKV path.
    B, C, H, W = 2, 128, 8, 8
    kx, kq, kk, kv, kbq, kbk, kbv, kg, kb = jax.random.split(key, 9)

    x = jax.random.normal(kx, (B, C, H, W), dtype=jnp.float32)

    params = {
        "gamma": 1.0 + 0.1 * jax.random.normal(kg, (C,), jnp.float32),
        "beta": 0.1 * jax.random.normal(kb, (C,), jnp.float32),
        "wq": 0.03 * jax.random.normal(kq, (C, C), jnp.float32),
        "bq": 0.03 * jax.random.normal(kbq, (C,), jnp.float32),
        "wk": 0.03 * jax.random.normal(kk, (C, C), jnp.float32),
        "bk": 0.03 * jax.random.normal(kbk, (C,), jnp.float32),
        "wv": 0.03 * jax.random.normal(kv, (C, C), jnp.float32),
        "bv": 0.03 * jax.random.normal(kbv, (C,), jnp.float32),
        # proj_out params exist in the PyTorch module but are never used in its forward.
    }

    out = jax.jit(nonlocal_block)(x, params)
    out = jax.block_until_ready(out)

    ref = nonlocal_block_ref(x, params)
    assert out.shape == (B, C, H, W)
    err = float(jnp.max(jnp.abs(out - ref)))
    # bf16 MXU operands (f32 accumulation) + approx reciprocal vs the all-f32 reference.
    assert err < 2e-2, f"mismatch vs reference: max abs err = {err}"

    print("KERNEL_OK")
</pallas_src>

<mosaic_0001>
module attributes {stable_mosaic.version = 11 : i64} {
  func.func @_gn_qkv_fused_kernel(%arg0: i32, %arg1: i32, %arg2: memref<1x64x128xf32, #tpu.memory_space<vmem>>, %arg3: memref<1x1x128xf32, #tpu.memory_space<vmem>>, %arg4: memref<1x1x384xf32, #tpu.memory_space<vmem>>, %arg5: memref<128x384xbf16, #tpu.memory_space<vmem>>, %arg6: memref<1x64x384xbf16, #tpu.memory_space<vmem>>) attributes {dimension_semantics = [#tpu.dimension_semantics<parallel>, #tpu.dimension_semantics<parallel>], iteration_bounds = array<i64: 2, 1>, scalar_prefetch = 0 : i64, scratch_operands = 0 : i64, tpu.core_type = #tpu.core_type<tc>, window_params = [{transform_indices = @transform_0, window_bounds = array<i64: 1, 64, 128>}, {transform_indices = @transform_1, window_bounds = array<i64: 1, 1, 128>}, {transform_indices = @transform_2, window_bounds = array<i64: 1, 1, 384>}, {pipeline_mode = #tpu.pipeline_mode<synchronous>, transform_indices = @transform_3, window_bounds = array<i64: 128, 384>}, {transform_indices = @transform_4, window_bounds = array<i64: 1, 64, 384>}]} {
    %c0 = arith.constant 0 : index
    %c0_0 = arith.constant 0 : index
    %c0_1 = arith.constant 0 : index
    %0 = vector.load %arg2[%c0, %c0_0, %c0_1] : memref<1x64x128xf32, #tpu.memory_space<vmem>>, vector<1x64x128xf32>
    %1 = vector.shape_cast %0 : vector<1x64x128xf32> to vector<64x128xf32>
    %c0_2 = arith.constant 0 : index
    %c0_3 = arith.constant 0 : index
    %c0_4 = arith.constant 0 : index
    %2 = vector.load %arg3[%c0_2, %c0_3, %c0_4] : memref<1x1x128xf32, #tpu.memory_space<vmem>>, vector<1x1x128xf32>
    %3 = vector.shape_cast %2 : vector<1x1x128xf32> to vector<1x128xf32>
    %4 = vector.broadcast %3 : vector<1x128xf32> to vector<64x128xf32>
    %5 = arith.mulf %1, %4 : vector<64x128xf32>
    %6 = arith.truncf %5 : vector<64x128xf32> to vector<64x128xbf16>
    %c0_5 = arith.constant 0 : index
    %c0_6 = arith.constant 0 : index
    %7 = vector.load %arg5[%c0_5, %c0_6] : memref<128x384xbf16, #tpu.memory_space<vmem>>, vector<128x384xbf16>
    %cst = arith.constant dense<0.000000e+00> : vector<64x384xf32>
    %8 = tpu.matmul %6, %7, %cst {dimension_numbers = #tpu.dot_dimension_numbers<[1], [0], [0], [1], [0, 0, 1, 1], [], []>} : vector<64x128xbf16>, vector<128x384xbf16>, vector<64x384xf32> -> vector<64x384xf32>
    %c0_7 = arith.constant 0 : index
    %c0_8 = arith.constant 0 : index
    %c0_9 = arith.constant 0 : index
    %9 = vector.load %arg4[%c0_7, %c0_8, %c0_9] : memref<1x1x384xf32, #tpu.memory_space<vmem>>, vector<1x1x384xf32>
    %10 = vector.shape_cast %9 : vector<1x1x384xf32> to vector<1x384xf32>
    %11 = vector.broadcast %10 : vector<1x384xf32> to vector<64x384xf32>
    %12 = arith.addf %8, %11 : vector<64x384xf32>
    %13 = arith.truncf %12 : vector<64x384xf32> to vector<64x384xbf16>
    %c0_10 = arith.constant 0 : index
    %c0_11 = arith.constant 0 : index
    %c0_12 = arith.constant 0 : index
    %14 = vector.load %arg6[%c0_10, %c0_11, %c0_12] : memref<1x64x384xbf16, #tpu.memory_space<vmem>>, vector<1x64x384xbf16>
    %15 = vector.shape_cast %14 : vector<1x64x384xbf16> to vector<64x384xbf16>
    %16 = vector.shape_cast %13 : vector<64x384xbf16> to vector<1x64x384xbf16>
    tpu.vector_store %arg6[%c0_10, %c0_11, %c0_12], %16 {strides = array<i32>} : memref<1x64x384xbf16, #tpu.memory_space<vmem>>, vector<1x64x384xbf16>,
    return
  }
  func.func @transform_0(%arg0: i32, %arg1: i32) -> (i32, i32, i32) {
    %c0_i32 = arith.constant 0 : i32
    %c0_i32_0 = arith.constant 0 : i32
    return %arg0, %arg1, %c0_i32 : i32, i32, i32
  }
  func.func @transform_1(%arg0: i32, %arg1: i32) -> (i32, i32, i32) {
    %c0_i32 = arith.constant 0 : i32
    %c0_i32_0 = arith.constant 0 : i32
    %c0_i32_1 = arith.constant 0 : i32
    return %arg0, %c0_i32, %c0_i32_0 : i32, i32, i32
  }
  func.func @transform_2(%arg0: i32, %arg1: i32) -> (i32, i32, i32) {
    %c0_i32 = arith.constant 0 : i32
    %c0_i32_0 = arith.constant 0 : i32
    %c0_i32_1 = arith.constant 0 : i32
    return %arg0, %c0_i32, %c0_i32_0 : i32, i32, i32
  }
  func.func @transform_3(%arg0: i32, %arg1: i32) -> (i32, i32) {
    %c0_i32 = arith.constant 0 : i32
    %c0_i32_0 = arith.constant 0 : i32
    %c0_i32_1 = arith.constant 0 : i32
    return %c0_i32, %c0_i32_0 : i32, i32
  }
  func.func @transform_4(%arg0: i32, %arg1: i32) -> (i32, i32, i32) {
    %c0_i32 = arith.constant 0 : i32
    %c0_i32_0 = arith.constant 0 : i32
    return %arg0, %arg1, %c0_i32 : i32, i32, i32
  }
}

module attributes {stable_mosaic.version = 11 : i64} {
  func.func @_flash_attn_residual_kernel(%arg0: i32, %arg1: i32, %arg2: i32, %arg3: memref<1x64x128xf32, #tpu.memory_space<vmem>>, %arg4: memref<1x64x128xbf16, #tpu.memory_space<vmem>>, %arg5: memref<1x64x128xbf16, #tpu.memory_space<vmem>>, %arg6: memref<1x64x128xbf16, #tpu.memory_space<vmem>>, %arg7: memref<1x64x128xf32, #tpu.memory_space<vmem>>, %arg8: memref<64x128xf32, #tpu.memory_space<vmem>>, %arg9: memref<64x128xf32, #tpu.memory_space<vmem>>, %arg10: memref<64x128xf32, #tpu.memory_space<vmem>>) attributes {dimension_semantics = [#tpu.dimension_semantics<parallel>, #tpu.dimension_semantics<parallel>, #tpu.dimension_semantics<arbitrary>], iteration_bounds = array<i64: 2, 1, 1>, scalar_prefetch = 0 : i64, scratch_operands = 3 : i64, tpu.core_type = #tpu.core_type<tc>, window_params = [{transform_indices = @transform_0, window_bounds = array<i64: 1, 64, 128>}, {transform_indices = @transform_1, window_bounds = array<i64: 1, 64, 128>}, {transform_indices = @transform_2, window_bounds = array<i64: 1, 64, 128>}, {transform_indices = @transform_3, window_bounds = array<i64: 1, 64, 128>}, {transform_indices = @transform_4, window_bounds = array<i64: 1, 64, 128>}]} {
    %c0_i32 = arith.constant 0 : i32
    %0 = arith.cmpi eq, %arg2, %c0_i32 : i32
    %1 = arith.extui %0 : i1 to i32
    %c0_i32_0 = arith.constant 0 : i32
    %2 = arith.cmpi ne, %1, %c0_i32_0 : i32
    scf.if %2 {
      %cst_28 = arith.constant 0xFF800000 : f32
      %44 = vector.broadcast %cst_28 : f32 to vector<64x128xf32>
      %c0_29 = arith.constant 0 : index
      %c0_30 = arith.constant 0 : index
      %45 = vector.load %arg8[%c0_29, %c0_30] : memref<64x128xf32, #tpu.memory_space<vmem>>, vector<64x128xf32>
      tpu.vector_store %arg8[%c0_29, %c0_30], %44 {strides = array<i32>} : memref<64x128xf32, #tpu.memory_space<vmem>>, vector<64x128xf32>,
      %cst_31 = arith.constant 0.000000e+00 : f32
      %46 = vector.broadcast %cst_31 : f32 to vector<64x128xf32>
      %c0_32 = arith.constant 0 : index
      %c0_33 = arith.constant 0 : index
      %47 = vector.load %arg9[%c0_32, %c0_33] : memref<64x128xf32, #tpu.memory_space<vmem>>, vector<64x128xf32>
      tpu.vector_store %arg9[%c0_32, %c0_33], %46 {strides = array<i32>} : memref<64x128xf32, #tpu.memory_space<vmem>>, vector<64x128xf32>,
      %cst_34 = arith.constant 0.000000e+00 : f32
      %48 = vector.broadcast %cst_34 : f32 to vector<64x128xf32>
      %c0_35 = arith.constant 0 : index
      %c0_36 = arith.constant 0 : index
      %49 = vector.load %arg10[%c0_35, %c0_36] : memref<64x128xf32, #tpu.memory_space<vmem>>, vector<64x128xf32>
      tpu.vector_store %arg10[%c0_35, %c0_36], %48 {strides = array<i32>} : memref<64x128xf32, #tpu.memory_space<vmem>>, vector<64x128xf32>,
    } else {
    }
    %c0 = arith.constant 0 : index
    %c0_1 = arith.constant 0 : index
    %c0_2 = arith.constant 0 : index
    %3 = vector.load %arg4[%c0, %c0_1, %c0_2] : memref<1x64x128xbf16, #tpu.memory_space<vmem>>, vector<1x64x128xbf16>
    %4 = vector.shape_cast %3 : vector<1x64x128xbf16> to vector<64x128xbf16>
    %c0_3 = arith.constant 0 : index
    %c0_4 = arith.constant 0 : index
    %c0_5 = arith.constant 0 : index
    %5 = vector.load %arg5[%c0_3, %c0_4, %c0_5] : memref<1x64x128xbf16, #tpu.memory_space<vmem>>, vector<1x64x128xbf16>
    %6 = vector.shape_cast %5 : vector<1x64x128xbf16> to vector<64x128xbf16>
    %c0_6 = arith.constant 0 : index
    %c0_7 = arith.constant 0 : index
    %c0_8 = arith.constant 0 : index
    %7 = vector.load %arg6[%c0_6, %c0_7, %c0_8] : memref<1x64x128xbf16, #tpu.memory_space<vmem>>, vector<1x64x128xbf16>
    %8 = vector.shape_cast %7 : vector<1x64x128xbf16> to vector<64x128xbf16>
    %cst = arith.constant dense<0.000000e+00> : vector<64x64xf32>
    %9 = tpu.matmul %4, %6, %cst {dimension_numbers = #tpu.dot_dimension_numbers<[1], [1], [0], [0], [0, 0, 1, 0], [], []>} : vector<64x128xbf16>, vector<64x128xbf16>, vector<64x64xf32> -> vector<64x64xf32>
    %c0_9 = arith.constant 0 : index
    %c0_10 = arith.constant 0 : index
    %10 = vector.load %arg8[%c0_9, %c0_10] : memref<64x128xf32, #tpu.memory_space<vmem>>, vector<64x128xf32>
    %cst_11 = arith.constant dense<0xFF800000> : vector<64xf32>
    %11 = vector.multi_reduction <maximumf>, %10, %cst_11 [1] : vector<64x128xf32> to vector<64xf32>
    %12 = vector.shape_cast %11 : vector<64xf32> to vector<64x1xf32>
    %c0_12 = arith.constant 0 : index
    %c0_13 = arith.constant 0 : index
    %13 = vector.load %arg9[%c0_12, %c0_13] : memref<64x128xf32, #tpu.memory_space<vmem>>, vector<64x128xf32>
    %cst_14 = arith.constant dense<0xFF800000> : vector<64xf32>
    %14 = vector.multi_reduction <maximumf>, %13, %cst_14 [1] : vector<64x128xf32> to vector<64xf32>
    %15 = vector.shape_cast %14 : vector<64xf32> to vector<64x1xf32>
    %cst_15 = arith.constant dense<0xFF800000> : vector<64xf32>
    %16 = vector.multi_reduction <maximumf>, %9, %cst_15 [1] : vector<64x64xf32> to vector<64xf32>
    %17 = vector.shape_cast %16 : vector<64xf32> to vector<64x1xf32>
    %18 = arith.maximumf %12, %17 : vector<64x1xf32>
    %19 = arith.subf %12, %18 : vector<64x1xf32>
    %20 = math.exp %19 : vector<64x1xf32>
    %21 = vector.broadcast %18 : vector<64x1xf32> to vector<64x64xf32>
    %22 = arith.subf %9, %21 : vector<64x64xf32>
    %23 = math.exp %22 : vector<64x64xf32>
    %24 = arith.mulf %20, %15 : vector<64x1xf32>
    %cst_16 = arith.constant dense<0.000000e+00> : vector<64xf32>
    %25 = vector.multi_reduction <add>, %23, %cst_16 [1] : vector<64x64xf32> to vector<64xf32>
    %26 = vector.shape_cast %25 : vector<64xf32> to vector<64x1xf32>
    %27 = arith.addf %24, %26 : vector<64x1xf32>
    %c0_17 = arith.constant 0 : index
    %c0_18 = arith.constant 0 : index
    %28 = vector.load %arg10[%c0_17, %c0_18] : memref<64x128xf32, #tpu.memory_space<vmem>>, vector<64x128xf32>
    %29 = vector.broadcast %20 : vector<64x1xf32> to vector<64x128xf32>
    %30 = arith.mulf %29, %28 : vector<64x128xf32>
    %31 = arith.truncf %23 : vector<64x64xf32> to vector<64x64xbf16>
    %cst_19 = arith.constant dense<0.000000e+00> : vector<64x128xf32>
    %32 = tpu.matmul %31, %8, %cst_19 {dimension_numbers = #tpu.dot_dimension_numbers<[1], [0], [0], [1], [0, 0, 1, 1], [], []>} : vector<64x64xbf16>, vector<64x128xbf16>, vector<64x128xf32> -> vector<64x128xf32>
    %33 = arith.addf %30, %32 : vector<64x128xf32>
    %34 = vector.shape_cast %18 : vector<64x1xf32> to vector<64x1xf32>
    %35 = vector.broadcast %34 : vector<64x1xf32> to vector<64x128xf32>
    %c0_20 = arith.constant 0 : index
    %c0_21 = arith.constant 0 : index
    %36 = vector.load %arg8[%c0_20, %c0_21] : memref<64x128xf32, #tpu.memory_space<vmem>>, vector<64x128xf32>
    tpu.vector_store %arg8[%c0_20, %c0_21], %35 {strides = array<i32>} : memref<64x128xf32, #tpu.memory_space<vmem>>, vector<64x128xf32>,
    %37 = vector.shape_cast %27 : vector<64x1xf32> to vector<64x1xf32>
    %38 = vector.broadcast %37 : vector<64x1xf32> to vector<64x128xf32>
    %c0_22 = arith.constant 0 : index
    %c0_23 = arith.constant 0 : index
    %39 = vector.load %arg9[%c0_22, %c0_23] : memref<64x128xf32, #tpu.memory_space<vmem>>, vector<64x128xf32>
    tpu.vector_store %arg9[%c0_22, %c0_23], %38 {strides = array<i32>} : memref<64x128xf32, #tpu.memory_space<vmem>>, vector<64x128xf32>,
    %c0_24 = arith.constant 0 : index
    %c0_25 = arith.constant 0 : index
    %40 = vector.load %arg10[%c0_24, %c0_25] : memref<64x128xf32, #tpu.memory_space<vmem>>, vector<64x128xf32>
    tpu.vector_store %arg10[%c0_24, %c0_25], %33 {strides = array<i32>} : memref<64x128xf32, #tpu.memory_space<vmem>>, vector<64x128xf32>,
    %c0_i32_26 = arith.constant 0 : i32
    %41 = arith.cmpi eq, %arg2, %c0_i32_26 : i32
    %42 = arith.extui %41 : i1 to i32
    %c0_i32_27 = arith.constant 0 : i32
    %43 = arith.cmpi ne, %42, %c0_i32_27 : i32
    scf.if %43 {
      %44 = tpu.reciprocal %27 {approx = true} : vector<64x1xf32> -> vector<64x1xf32>
      %c0_28 = arith.constant 0 : index
      %c0_29 = arith.constant 0 : index
      %c0_30 = arith.constant 0 : index
      %45 = vector.load %arg3[%c0_28, %c0_29, %c0_30] : memref<1x64x128xf32, #tpu.memory_space<vmem>>, vector<1x64x128xf32>
      %46 = vector.shape_cast %45 : vector<1x64x128xf32> to vector<64x128xf32>
      %47 = vector.broadcast %44 : vector<64x1xf32> to vector<64x128xf32>
      %48 = arith.mulf %33, %47 : vector<64x128xf32>
      %49 = arith.addf %46, %48 : vector<64x128xf32>
      %c0_31 = arith.constant 0 : index
      %c0_32 = arith.constant 0 : index
      %c0_33 = arith.constant 0 : index
      %50 = vector.load %arg7[%c0_31, %c0_32, %c0_33] : memref<1x64x128xf32, #tpu.memory_space<vmem>>, vector<1x64x128xf32>
      %51 = vector.shape_cast %50 : vector<1x64x128xf32> to vector<64x128xf32>
      %52 = vector.shape_cast %49 : vector<64x128xf32> to vector<1x64x128xf32>
      tpu.vector_store %arg7[%c0_31, %c0_32, %c0_33], %52 {strides = array<i32>} : memref<1x64x128xf32, #tpu.memory_space<vmem>>, vector<1x64x128xf32>,
    } else {
    }
    return
  }
  func.func @transform_0(%arg0: i32, %arg1: i32, %arg2: i32) -> (i32, i32, i32) {
    %c0_i32 = arith.constant 0 : i32
    %c0_i32_0 = arith.constant 0 : i32
    return %arg0, %arg1, %c0_i32 : i32, i32, i32
  }
  func.func @transform_1(%arg0: i32, %arg1: i32, %arg2: i32) -> (i32, i32, i32) {
    %c0_i32 = arith.constant 0 : i32
    %c0_i32_0 = arith.constant 0 : i32
    return %arg0, %arg1, %c0_i32 : i32, i32, i32
  }
  func.func @transform_2(%arg0: i32, %arg1: i32, %arg2: i32) -> (i32, i32, i32) {
    %c1_i32 = arith.constant 1 : i32
    %c0_i32 = arith.constant 0 : i32
    return %arg0, %arg2, %c1_i32 : i32, i32, i32
  }
  func.func @transform_3(%arg0: i32, %arg1: i32, %arg2: i32) -> (i32, i32, i32) {
    %c2_i32 = arith.constant 2 : i32
    %c0_i32 = arith.constant 0 : i32
    return %arg0, %arg2, %c2_i32 : i32, i32, i32
  }
  func.func @transform_4(%arg0: i32, %arg1: i32, %arg2: i32) -> (i32, i32, i32) {
    %c0_i32 = arith.constant 0 : i32
    %c0_i32_0 = arith.constant 0 : i32
    return %arg0, %arg1, %c0_i32 : i32, i32, i32
  }
}

</mosaic_0001>

<bundles_post_ra>
// kernel: mul.6
= control target key start
LH: loop header
LB: loop body
LE: loop exit
PB: predicated region body
PF: predicated region fallthrough
CT: control target
= control target key end

     0   :  { %s56_s0 = inlined_call_operand.vmem [shape: f32[2,1,128], index: 0, kind: input, shape index: {}]   ;;  %s57_s1 = inlined_call_operand.vmem [shape: f32[2,1,128], index: 1, kind: input, shape index: {}]   ;;  %s58_s2 = inlined_call_operand.vmem [shape: f32[2,1,128], index: 2, kind: output, shape index: {}]  }
   0x1   :  { %v3_v0 = vld [vmem:[%s56_s0] sm:$0x1]  ;;  %v20_v2 = vld [vmem:[%s56_s0 + $0x1] sm:$0x1] }
   0x2   :  { %v4_v1 = vld [vmem:[%s57_s1] sm:$0x1]  ;;  %v21_v4 = vld [vmem:[%s57_s1 + $0x1] sm:$0x1] }
   0x3   :  { %v7_v3 = vmul.f32 %v4_v1, %v3_v0  ;;  %v16_v5 = vmul.f32 %v21_v4, %v20_v2 }
   0x5   :  { %9 = vst [vmem:[%s58_s2] sm:$0x1] %v7_v3  ;;  %22 = vst [vmem:[%s58_s2 + $0x1] sm:$0x1] %v16_v5 }

// kernel: nonlocal_block.2
= control target key start
LH: loop header
LB: loop body
LE: loop exit
PB: predicated region body
PF: predicated region fallthrough
CT: control target
= control target key end

     0   :  { %s1036_s15 = smov 0   ;;  %s1038_s16 = smov 0   ;;  %s1205_s0 = inlined_call_operand.vmem [shape: f32[2,64,128], index: 0, kind: input, shape index: {}]   ;;  %s1206_s1 = inlined_call_operand.vmem [shape: f32[2,1,128], index: 1, kind: input, shape index: {}]   ;;  %s1207_s2 = inlined_call_operand.vmem [shape: f32[2,1,384], index: 2, kind: input, shape index: {}]   ;;  %s1208_s3 = inlined_call_operand.vmem [shape: bf16[128,384], index: 3, kind: input, shape index: {}]   ;;  %s1209_s4 = inlined_call_operand.vmem [shape: bf16[2,64,384], index: 4, kind: output, shape index: {}]  }
   0x1   :  { %s1040_s17 = smov 0  }
   0x2 LB: > { %s26_s18 = sadd.s32 1, %s1004_s16  ;;  %p827_p0 = scmp.ge.s32.totalorder %s1008_s17, 1  ;;  %s1008_s17 = sphi %s1040_s17, %s14_s17   ;;  %s1004_s16 = sphi %s1038_s16, %s1211_s16   ;;  %s1000_s15 = sphi %s1036_s15, %s1210_s15  }
   0x3   : > { %p28_p1 = scmp.ge.s32.totalorder %s26_s18, 2  ;;  %p200_p2 = scmp.lt.s32.totalorder %s1008_s17, 3 }
   0x5   : > { %s1213_s18 = smov (%p28_p1, %s26_s18), 0  ;;  %p201_p3 = pnand %p827_p0, %p200_p2 }
   0x6   : > { %v954_v0 = vld [vmem:[%s1208_s3 + $0x4] ss:$12 sps:$4 sm:$0xff] (!%p201_p3)   ;;  %v956_v1 = vld [vmem:[%s1208_s3] ss:$12 sps:$4 sm:$0xff] (!%p201_p3)   ;;  %v1010_v2 = vmov (!%p201_p3), 0   ;;  %p243_p4 = scmp.lt.s32.totalorder (!%p201_p3), %s1000_s15, 1  ;;  %v332_v46 = vlaneseq (!%p201_p3) }
   0x7   : > { %204 = sbr.rel (%p201_p3) target bundleno = 283 (0x11b), region = 36  ;;  %507 = vmatprep.mubr.bf16.mxu0 (!%p201_p3), %v1010_v2  ;;  %475 = vmatprep.subr.bf16.mxu0 (!%p201_p3), %v954_v0  ;;  %v957_v3 = vld [vmem:[%s1208_s3 + $0x1c] ss:$12 sps:$4 sm:$0xff] (!%p201_p3)   ;;  %v959_v4 = vld [vmem:[%s1208_s3 + $0x18] ss:$12 sps:$4 sm:$0xff] (!%p201_p3)  }
   0x8   : > { %476 = vmatpush1.bf16.msra.mxu0 (!%p201_p3), %v956_v1  ;;  %v960_v5 = vld [vmem:[%s1208_s3 + $0x34] ss:$12 sps:$4 sm:$0xff] (!%p201_p3)   ;;  %v962_v7 = vld [vmem:[%s1208_s3 + $0x30] ss:$12 sps:$4 sm:$0xff] (!%p201_p3)   ;;  %v963_v8 = vld [vmem:[%s1208_s3 + $0x4c] ss:$12 sps:$4 sm:$0xff] (!%p201_p3)  }
   0x9   : > { %477 = vmatprep.subr.bf16.mxu0 (!%p201_p3), %v957_v3  ;;  %v966_v6 = vld [vmem:[%s1208_s3 + $0x8] ss:$12 sps:$4 sm:$0xff] (!%p201_p3)   ;;  %v970_v9 = vld [vmem:[%s1208_s3 + $0x20] ss:$12 sps:$4 sm:$0xff] (!%p201_p3)   ;;  %v974_v10 = vld [vmem:[%s1208_s3 + $0x38] ss:$12 sps:$4 sm:$0xff] (!%p201_p3)  }
   0xa   : > { %903 = vmatprep.subr.bf16.mxu1 (!%p201_p3), %v966_v6  ;;  %v965_v11 = vld [vmem:[%s1208_s3 + $0x48] ss:$12 sps:$4 sm:$0xff] (!%p201_p3)   ;;  %v967_v12 = vld [vmem:[%s1208_s3 + $0x64] ss:$12 sps:$4 sm:$0xff] (!%p201_p3)   ;;  %v969_v13 = vld [vmem:[%s1208_s3 + $0x60] ss:$12 sps:$4 sm:$0xff] (!%p201_p3)  }
   0xb   : > { %904 = vmatpush3.bf16.msra.mxu1 (!%p201_p3), %v966_v6  ;;  %v978_v14 = vld [vmem:[%s1208_s3 + $0x50] ss:$12 sps:$4 sm:$0xff] (!%p201_p3)   ;;  %v982_v21 = vld [vmem:[%s1208_s3 + $0x68] ss:$12 sps:$4 sm:$0xff] (!%p201_p3)   ;;  %v973_v22 = vld [vmem:[%s1208_s3 + $0x78] ss:$12 sps:$4 sm:$0xff] (!%p201_p3)  }
   0xc   : > { %478 = vmatpush1.bf16.msra.mxu0 (!%p201_p3), %v959_v4  ;;  %905 = vmatprep.subr.bf16.mxu1 (!%p201_p3), %v970_v9  ;;  %v971_v15 = vld [vmem:[%s1208_s3 + $0x7c] ss:$12 sps:$4 sm:$0xff] (!%p201_p3)   ;;  %v975_v24 = vld [vmem:[%s1208_s3 + $0x94] ss:$12 sps:$4 sm:$0xff] (!%p201_p3)   ;;  %v979_v27 = vld [vmem:[%s1208_s3 + $0xac] ss:$12 sps:$4 sm:$0xff] (!%p201_p3)  }
   0xd   : > { %479 = vmatprep.subr.bf16.mxu0 (!%p201_p3), %v960_v5  ;;  %v983_v25 = vld [vmem:[%s1208_s3 + $0x80] ss:$12 sps:$4 sm:$0xff] (!%p201_p3)   ;;  %v977_v26 = vld [vmem:[%s1208_s3 + $0x90] ss:$12 sps:$4 sm:$0xff] (!%p201_p3)   ;;  %v984_v28 = vld [vmem:[%s1208_s3 + $0x98] ss:$12 sps:$4 sm:$0xff] (!%p201_p3)  }
   0xe   : > { %s1215_s15 = smov (!%p243_p4, %s1000_s15), 1  ;;  %v981_v29 = vld [vmem:[%s1208_s3 + $0xa8] ss:$12 sps:$4 sm:$0xff]   ;;  %v985_v30 = vld [vmem:[%s1208_s3 + $0xb0] ss:$12 sps:$4 sm:$0xff]   ;;  %v333_v47 = vshrl.u32 %v332_v46, 7 }
   0xf   : > { %s874_s11 = sshll.u32 %s1215_s15, 6  ;;  %906 = vmatpush3.bf16.msra.mxu1 %v970_v9  ;;  %s254_s27 = scalar_lea.vmem %s1206_s1, %s1215_s15 }
  0x10   : > { %480 = vmatpush1.bf16.msra.mxu0 %v962_v7  ;;  %s1097_s24 = scalar_lea.vmem %s1205_s0, %s874_s11  ;;  %907 = vmatprep.subr.bf16.mxu1 %v974_v10  ;;  %v831_v18 = vld [vmem:[%s254_s27] ss:$0 sm:$0xff]  ;;  %s927_s5 = smul.u32 3, %s1215_s15  ;;  %v334_v48 = vsub.s32 0, %v333_v47  ;;  %v338_v50 = vsub.s32 1, %v333_v47  ;;  %v342_v53 = vsub.s32 2, %v333_v47 }
  0x11   : > { %481 = vmatprep.subr.bf16.mxu0 %v963_v8  ;;  %v271_v16 = vld [vmem:[%s1097_s24] sm:$0xff]  ;;  %v272_v17 = vld [vmem:[%s1097_s24 + $0x8] sm:$0xff]  ;;  %v273_v31 = vld [vmem:[%s1097_s24 + $0x10] sm:$0xff]  ;;  %s928_s8 = smul.u32 96, %s1215_s15 }
  0x12   : > { %v286_v19 = vmul.f32 %v831_v18, %v271_v16  ;;  %v287_v20 = vmul.f32 %v831_v18, %v272_v17  ;;  %v274_v32 = vld [vmem:[%s1097_s24 + $0x18] sm:$0xff]  ;;  %v275_v33 = vld [vmem:[%s1097_s24 + $0x20] sm:$0xff]  ;;  %v276_v34 = vld [vmem:[%s1097_s24 + $0x28] sm:$0xff]  ;;  %v288_v35 = vmul.f32 %v831_v18, %v273_v31  ;;  %s258_s7 = scalar_lea.vmem %s1207_s2, %s927_s5 }
  0x13   : > { %908 = vmatpush3.bf16.msra.mxu1 %v974_v10  ;;  %v289_v36 = vmul.f32 %v831_v18, %v274_v32  ;;  %v290_v37 = vmul.f32 %v831_v18, %v275_v33  ;;  %v291_v38 = vmul.f32 %v831_v18, %v276_v34  ;;  %v277_v39 = vld [vmem:[%s1097_s24 + $0x30] sm:$0xff]  ;;  %v278_v40 = vld [vmem:[%s1097_s24 + $0x38] sm:$0xff]  ;;  %v330_v49 = vld [vmem:[%s258_s7] sm:$0x7]  ;;  %s1164_s11 = scalar_lea.vmem %s1209_s4, %s928_s8 }
  0x14   : > { %482 = vmatpush1.bf16.msra.mxu0 %v965_v11  ;;  %909 = vmatprep.subr.bf16.mxu1 %v978_v14  ;;  %v294_v23 = vpack.c.bf16 %v287_v20, %v286_v19  ;;  %v292_v43 = vmul.f32 %v831_v18, %v277_v39  ;;  %v293_v44 = vmul.f32 %v831_v18, %v278_v40 }
  0x15   : > { %483 = vmatprep.subr.bf16.mxu0 %v967_v12  ;;  %v295_v41 = vpack.c.bf16 %v289_v36, %v288_v35  ;;  %v296_v42 = vpack.c.bf16 %v291_v38, %v290_v37  ;;  %v1154_v51 = vrot.slane %v330_v49, %v334_v48  ;;  %v1156_v52 = vrot.slane %v330_v49, %v338_v50 }
  0x16   : > { %919 = vmatprep.mubr.bf16.mxu1 %v294_v23  ;;  %v297_v45 = vpack.c.bf16 %v293_v44, %v292_v43  ;;  %v343_v61 = vrot.slane %v330_v49, %v342_v53 }
  0x17   : > { %910 = vmatpush3.bf16.msra.mxu1 %v978_v14 }
  0x18   : > { %484 = vmatpush1.bf16.msra.mxu0 %v969_v13  ;;  %911 = vmatprep.subr.bf16.mxu1 %v982_v21 }
  0x19   : > { %485 = vmatprep.subr.bf16.mxu0 %v971_v15 }
  0x1b   : > { %912 = vmatpush3.bf16.msra.mxu1 %v982_v21 }
  0x1c   : > { %486 = vmatpush1.bf16.msra.mxu0 %v973_v22  ;;  %913 = vmatprep.subr.bf16.mxu1 %v983_v25 }
  0x1d   : > { %487 = vmatprep.subr.bf16.mxu0 %v975_v24 }
  0x1f   : > { %914 = vmatpush3.bf16.msra.mxu1 %v983_v25 }
  0x20   : > { %488 = vmatpush1.bf16.msra.mxu0 %v977_v26  ;;  %915 = vmatprep.subr.bf16.mxu1 %v984_v28 }
  0x21   : > { %489 = vmatprep.subr.bf16.mxu0 %v979_v27 }
  0x23   : > { %916 = vmatpush3.bf16.msra.mxu1 %v984_v28 }
  0x24   : > { %490 = vmatpush1.bf16.msra.mxu0 %v981_v29  ;;  %917 = vmatprep.subr.bf16.mxu1 %v985_v30 }
  0x27   : > { %508 = vmatmul.mubr.bf16.vlgmr.msra.gmra.mrb[0].mxu0 %v294_v23  ;;  %918 = vmatpush3.bf16.msra.mxu1 %v985_v30 }
  0x28   : > { %517 = vmatprep.mubr.bf16.mxu0 %v1010_v2 }
  0x2a   : > { %920 = vmatmul.mubr.bf16.vlgmr.msra.gmra.mrb[0].mxu1 %v295_v41 }
  0x2b   : > { %923 = vmatprep.mubr.bf16.mxu1 %v296_v42 }
  0x2f   : > { %518 = vmatmul.mubr.bf16.gmra.mrb[4].mxu0 %v295_v41 }
  0x30   : > { %527 = vmatprep.mubr.bf16.mxu0 %v1010_v2 }
  0x32   : > { %924 = vmatmul.mubr.bf16.gmra.mrb[4].mxu1 %v297_v45 }
  0x37   : > { %528 = vmatmul.mubr.bf16.gmra.mrb[8].mxu0 %v296_v42 }
  0x38   : > { %537 = vmatprep.mubr.bf16.mxu0 %v1010_v2 }
  0x3f   : > { %538 = vmatmul.mubr.bf16.gmra.mrb[12].mxu0 %v297_v45 }
  0xfa   : > { %v509_v54 = vpop.f32.mrb[0].mxu0 }
  0xfb   : > { %v510_v55 = vadd.f32 %v509_v54, %v1154_v51  ;;  %v511_v56 = vpop.f32.mrb[1].mxu0 }
  0xfc   : > { %v512_v57 = vadd.f32 %v511_v56, %v1156_v52  ;;  %v513_v58 = vpop.f32.mrb[2].mxu0 }
  0xfd   : > { %v514_v59 = vadd.f32 %v513_v58, %v1154_v51  ;;  %v515_v60 = vpop.f32.mrb[3].mxu0  ;;  %v921_v1 = vpop.f32.mrb[0].mxu1 }
  0xfe   : > { %v875_v62 = vpack.c.bf16 %v512_v57, %v510_v55  ;;  %v516_v63 = vadd.f32 %v515_v60, %v1156_v52  ;;  %v591_v2 = vadd.f32 %v921_v1, %v343_v61  ;;  %v582_v3 = vpop.f32.mrb[1].mxu1 }
  0xff   : > { %v583_v5 = vadd.f32 %v582_v3, %v343_v61  ;;  %v922_v6 = vpop.f32.mrb[2].mxu1 }
 0x100   : > { %693 = vst [vmem:[%s1164_s11] sm:$0xff] %v875_v62  ;;  %v877_v0 = vpack.c.bf16 %v516_v63, %v514_v59  ;;  %v880_v9 = vpack.c.bf16 %v591_v2, %v591_v2  ;;  %v594_v10 = vadd.f32 %v922_v6, %v343_v61  ;;  %v585_v11 = vpop.f32.mrb[3].mxu1 }
 0x101   : > { %v876_v14 = vpack.c.bf16 %v583_v5, %v583_v5  ;;  %v586_v15 = vadd.f32 %v585_v11, %v343_v61 }
 0x102   : > { %695 = vst [vmem:[%s1164_s11 + $0xc] sm:$0xff] %v877_v0  ;;  %v519_v4 = vpop.f32.mrb[4].mxu0  ;;  %698 = vst [vmem:[%s1164_s11 + $0x20] sm:$0xf] %v880_v9  ;;  %v882_v18 = vpack.c.bf16 %v594_v10, %v594_v10 }
 0x103   : > { %v520_v7 = vadd.f32 %v519_v4, %v1154_v51  ;;  %v521_v8 = vpop.f32.mrb[5].mxu0  ;;  %694 = vst [vmem:[%s1164_s11 + $0x8] sm:$0xf] %v876_v14  ;;  %v878_v21 = vpack.c.bf16 %v586_v15, %v586_v15 }
 0x104   : > { %v522_v12 = vadd.f32 %v521_v8, %v1156_v52  ;;  %v523_v13 = vpop.f32.mrb[6].mxu0  ;;  %700 = vst [vmem:[%s1164_s11 + $0x2c] sm:$0xf] %v882_v18 }
 0x105   : > { %v524_v16 = vadd.f32 %v523_v13, %v1154_v51  ;;  %v525_v17 = vpop.f32.mrb[7].mxu0  ;;  %696 = vst [vmem:[%s1164_s11 + $0x14] sm:$0xf] %v878_v21  ;;  %v925_v23 = vpop.f32.mrb[4].mxu1 }
 0x106   : > { %v879_v19 = vpack.c.bf16 %v522_v12, %v520_v7  ;;  %v526_v20 = vadd.f32 %v525_v17, %v1156_v52  ;;  %v607_v24 = vadd.f32 %v925_v23, %v343_v61  ;;  %v598_v25 = vpop.f32.mrb[5].mxu1 }
 0x107   : > { %v599_v27 = vadd.f32 %v598_v25, %v343_v61  ;;  %v926_v28 = vpop.f32.mrb[6].mxu1 }
 0x108   : > { %697 = vst [vmem:[%s1164_s11 + $0x18] sm:$0xff] %v879_v19  ;;  %v881_v22 = vpack.c.bf16 %v526_v20, %v524_v16  ;;  %v888_v31 = vpack.c.bf16 %v607_v24, %v607_v24  ;;  %v610_v32 = vadd.f32 %v926_v28, %v343_v61  ;;  %v601_v33 = vpop.f32.mrb[7].mxu1 }
 0x109   : > { %v884_v36 = vpack.c.bf16 %v599_v27, %v599_v27  ;;  %v602_v37 = vadd.f32 %v601_v33, %v343_v61 }
 0x10a   : > { %699 = vst [vmem:[%s1164_s11 + $0x24] sm:$0xff] %v881_v22  ;;  %v529_v26 = vpop.f32.mrb[8].mxu0  ;;  %706 = vst [vmem:[%s1164_s11 + $0x50] sm:$0xf] %v888_v31  ;;  %v890_v40 = vpack.c.bf16 %v610_v32, %v610_v32 }
 0x10b   : > { %v530_v29 = vadd.f32 %v529_v26, %v1154_v51  ;;  %v531_v30 = vpop.f32.mrb[9].mxu0  ;;  %702 = vst [vmem:[%s1164_s11 + $0x38] sm:$0xf] %v884_v36  ;;  %v886_v43 = vpack.c.bf16 %v602_v37, %v602_v37 }
 0x10c   : > { %v532_v34 = vadd.f32 %v531_v30, %v1156_v52  ;;  %v533_v35 = vpop.f32.mrb[10].mxu0  ;;  %708 = vst [vmem:[%s1164_s11 + $0x5c] sm:$0xf] %v890_v40 }
 0x10d   : > { %v534_v38 = vadd.f32 %v533_v35, %v1154_v51  ;;  %v535_v39 = vpop.f32.mrb[11].mxu0  ;;  %704 = vst [vmem:[%s1164_s11 + $0x44] sm:$0xf] %v886_v43 }
 0x10e   : > { %v883_v41 = vpack.c.bf16 %v532_v34, %v530_v29  ;;  %v536_v42 = vadd.f32 %v535_v39, %v1156_v52 }
 0x110   : > { %701 = vst [vmem:[%s1164_s11 + $0x30] sm:$0xff] %v883_v41  ;;  %v885_v44 = vpack.c.bf16 %v536_v42, %v534_v38 }
 0x112   : > { %703 = vst [vmem:[%s1164_s11 + $0x3c] sm:$0xff] %v885_v44  ;;  %v539_v45 = vpop.f32.mrb[12].mxu0 }
 0x113   : > { %v540_v46 = vadd.f32 %v539_v45, %v1154_v51  ;;  %v541_v47 = vpop.f32.mrb[13].mxu0 }
 0x114   : > { %v542_v48 = vadd.f32 %v541_v47, %v1156_v52  ;;  %v543_v49 = vpop.f32.mrb[14].mxu0 }
 0x115   : > { %v544_v50 = vadd.f32 %v543_v49, %v1154_v51  ;;  %v545_v53 = vpop.f32.mrb[15].mxu0 }
 0x116   : > { %v887_v54 = vpack.c.bf16 %v542_v48, %v540_v46  ;;  %v546_v55 = vadd.f32 %v545_v53, %v1156_v52 }
 0x118   : > { %705 = vst [vmem:[%s1164_s11 + $0x48] sm:$0xff] %v887_v54  ;;  %v889_v56 = vpack.c.bf16 %v546_v55, %v544_v50 }
 0x11a   : > { %707 = vst [vmem:[%s1164_s11 + $0x54] sm:$0xff] %v889_v56 }
 0x11b PF: > { %s14_s17 = sadd.s32 1, %s1008_s17   ;;  %s1210_s15 = smov %s1004_s16 }
 0x11c   : > { %p11_p5 = scmp.ge.s32.totalorder %s14_s17, 4   ;;  %s1211_s16 = smov %s1213_s18 }
 0x11e   :  { %13 = sbr.rel (!%p11_p5) target bundleno = 2 (0x2), region = 72 }

// kernel: nonlocal_block.3
= control target key start
LH: loop header
LB: loop body
LE: loop exit
PB: predicated region body
PF: predicated region fallthrough
CT: control target
= control target key end

     0   :  { %9 = vsyncpa [#allocation9], 0  ;;  %s1837_s0 = inlined_call_operand.vmem [shape: f32[2,64,128], index: 0, kind: input, shape index: {}]   ;;  %s1838_s1 = inlined_call_operand.vmem [shape: bf16[2,64,384], index: 1, kind: input, shape index: {}, may-alias: {1,2,3}]   ;;  %s1839_s2 = inlined_call_operand.vmem [shape: bf16[2,64,384], index: 2, kind: input, shape index: {}, may-alias: {1,2,3}]   ;;  %s1840_s3 = inlined_call_operand.vmem [shape: bf16[2,64,384], index: 3, kind: input, shape index: {}, may-alias: {1,2,3}]   ;;  %s1841_s4 = inlined_call_operand.hbm [shape: f32[2,64,128], index: 4, kind: output, shape index: {}]  }
   0x1   :  { %11 = vsyncpa [#allocation9 + $0x1], 0  ;;  %s1552_s15 = smov 0   ;;  %s1554_s16 = smov 0  }
   0x2   :  { %s1556_s17 = smov 0   ;;  %s1558_s18 = smov 0  }
   0x3   :  { %s1560_s19 = smov 0   ;;  %s1562_s20 = smov 0  }
   0x4 LB: > { %s1218_s21 = sadd.s32 4294967295, %s1520_s20   ;;  %s1219_s22 = sadd.s32 4294967294, %s1520_s20   ;;  %s1520_s20 = sphi %s1562_s20, %s17_s20   ;;  %s1516_s19 = sphi %s1560_s19, %s1849_s19   ;;  %s1512_s18 = sphi %s1558_s18, %s1848_s18   ;;  %s1508_s17 = sphi %s1556_s17, %s1847_s17   ;;  %s1504_s16 = sphi %s1554_s16, %s1846_s16   ;;  %s1500_s15 = sphi %s1552_s15, %s1845_s15  }
   0x5   : > { %s36_s23 = sadd.s32 1, %s1516_s19  ;;  %s73_s24 = sadd.s32 1, %s1508_s17 }
   0x6   : > { %p38_p0 = scmp.ge.s32.totalorder %s36_s23, 2  ;;  %p80_p1 = scmp.ne.s32.totalorder %s1508_s17, %s1504_s16 }
   0x7   : > { %p81_p2 = scmp.eq.s32.totalorder %s1520_s20, 0  ;;  %p168_p3 = scmp.eq.s32.totalorder %s1218_s21, 1 }
   0x8   : > { %s1851_s23 = smov (%p38_p0, %s36_s23), 0  ;;  %p173_p6 = scmp.ne.s32.totalorder %s1504_s16, %s1500_s15 }
   0x9   : > { %p1591_p4 = por %p81_p2, %p80_p1  ;;  %p1595_p5 = por %p168_p3, %p80_p1 }
   0xa   : > { %s68_s27 = ssub.s32 %s1516_s19, %s1851_s23  ;;  %p174_p8 = scmp.eq.s32.totalorder %s1219_s22, 1 }
   0xb   : > { %p71_p7 = scmp.eq.s32.totalorder %s68_s27, 0  ;;  %p1221_p10 = scmp.ge.s32.totalorder %s1520_s20, 2 }
   0xc   : > { %p1606_p9 = por %p174_p8, %p173_p6 }
   0xd   : > { %s1604_s28 = scalar_select %p71_p7, %s1508_s17, %s73_s24  }
   0xe   : > { %190 = sbr.rel (%p1221_p10) target bundleno = 51 (0x33), region = 16 }
  0x15   : > { %206 = sbr.rel (!%p1591_p4) target bundleno = 31 (0x1f), region = 24  ;;  %s208_s30 = sand.u32 (%p1591_p4), 1, %s1508_s17  }
  0x16   : > { %s1322_s5 = smul.u32 (%p1591_p4), 96, %s1516_s19  ;;  %s1222_s6 = sshll.u32 (%p1591_p4), %s208_s30, 5 }
  0x17   : > { %s210_s10 = scalar_lea.vmem (%p1591_p4), [#allocation5], %s1222_s6 }
  0x18   : > { %s216_s9 = scalar_lea.vmem (%p1591_p4), %s1838_s1, %s1322_s5 }
  0x19   : > { %v232_v0 = vld [vmem:[%s216_s9] sm:$0xf] (%p1591_p4)  ;;  %v234_v1 = vld [vmem:[%s216_s9 + $0xc] sm:$0xf] (%p1591_p4)  ;;  %v236_v2 = vld [vmem:[%s216_s9 + $0x18] sm:$0xf] (%p1591_p4) }
  0x1a   : > { %233 = vst [vmem:[%s210_s10] sm:$0xf] (%p1591_p4), %v232_v0  ;;  %235 = vst [vmem:[%s210_s10 + $0x4] sm:$0xf] (%p1591_p4), %v234_v1  ;;  %v238_v3 = vld [vmem:[%s216_s9 + $0x24] sm:$0xf] (%p1591_p4) }
  0x1b   : > { %237 = vst [vmem:[%s210_s10 + $0x8] sm:$0xf] (%p1591_p4), %v236_v2  ;;  %v240_v4 = vld [vmem:[%s216_s9 + $0x30] sm:$0xf] (%p1591_p4)  ;;  %v242_v5 = vld [vmem:[%s216_s9 + $0x3c] sm:$0xf] (%p1591_p4) }
  0x1c   : > { %239 = vst [vmem:[%s210_s10 + $0xc] sm:$0xf] %v238_v3  ;;  %241 = vst [vmem:[%s210_s10 + $0x10] sm:$0xf] %v240_v4  ;;  %v244_v6 = vld [vmem:[%s216_s9 + $0x48] sm:$0xf] }
  0x1d   : > { %243 = vst [vmem:[%s210_s10 + $0x14] sm:$0xf] %v242_v5  ;;  %v246_v7 = vld [vmem:[%s216_s9 + $0x54] sm:$0xf]  ;;  %245 = vst [vmem:[%s210_s10 + $0x18] sm:$0xf] %v244_v6 }
  0x1e   : > { %247 = vst [vmem:[%s210_s10 + $0x1c] sm:$0xf] %v246_v7 }
  0x1f PF: > { %286 = sbr.rel (!%p1591_p4) target bundleno = 41 (0x29), region = 65  ;;  %s288_s11 = sand.u32 (%p1591_p4), 1, %s1508_s17  }
  0x20   : > { %s1225_s12 = smul.u32 (%p1591_p4), 96, %s1516_s19  ;;  %s1224_s13 = sshll.u32 (%p1591_p4), %s288_s11, 5 }
  0x21   : > { %s290_s24 = scalar_lea.vmem (%p1591_p4), [#allocation6], %s1224_s13 }
  0x22   : > { %s1112_s22 = scalar_lea.vmem (%p1591_p4), %s1839_s2, %s1225_s12 }
  0x23   : > { %v1226_v8 = vld [vmem:[%s1112_s22 + $0x4] sm:$0xf] (%p1591_p4)  ;;  %v1227_v9 = vld [vmem:[%s1112_s22 + $0x10] sm:$0xf] (%p1591_p4)  ;;  %v1228_v10 = vld [vmem:[%s1112_s22 + $0x1c] sm:$0xf] (%p1591_p4) }
  0x24   : > { %314 = vst [vmem:[%s290_s24] sm:$0xf] (%p1591_p4), %v1226_v8  ;;  %316 = vst [vmem:[%s290_s24 + $0x4] sm:$0xf] (%p1591_p4), %v1227_v9  ;;  %v1229_v11 = vld [vmem:[%s1112_s22 + $0x28] sm:$0xf] (%p1591_p4) }
  0x25   : > { %318 = vst [vmem:[%s290_s24 + $0x8] sm:$0xf] (%p1591_p4), %v1228_v10  ;;  %v1230_v12 = vld [vmem:[%s1112_s22 + $0x34] sm:$0xf] (%p1591_p4)  ;;  %v1231_v13 = vld [vmem:[%s1112_s22 + $0x40] sm:$0xf] (%p1591_p4) }
  0x26   : > { %320 = vst [vmem:[%s290_s24 + $0xc] sm:$0xf] %v1229_v11  ;;  %322 = vst [vmem:[%s290_s24 + $0x10] sm:$0xf] %v1230_v12  ;;  %v1232_v14 = vld [vmem:[%s1112_s22 + $0x4c] sm:$0xf] }
  0x27   : > { %324 = vst [vmem:[%s290_s24 + $0x14] sm:$0xf] %v1231_v13  ;;  %v1233_v15 = vld [vmem:[%s1112_s22 + $0x58] sm:$0xf]  ;;  %326 = vst [vmem:[%s290_s24 + $0x18] sm:$0xf] %v1232_v14 }
  0x28   : > { %328 = vst [vmem:[%s290_s24 + $0x1c] sm:$0xf] %v1233_v15 }
  0x29 PF: > { %367 = sbr.rel (!%p1591_p4) target bundleno = 51 (0x33), region = 106  ;;  %s369_s27 = sand.u32 (%p1591_p4), 1, %s1508_s17  }
  0x2a   : > { %s1235_s30 = smul.u32 (%p1591_p4), 96, %s1516_s19  ;;  %s1234_s5 = sshll.u32 (%p1591_p4), %s369_s27, 5 }
  0x2b   : > { %s371_s9 = scalar_lea.vmem (%p1591_p4), [#allocation7], %s1234_s5 }
  0x2c   : > { %s1120_s8 = scalar_lea.vmem (%p1591_p4), %s1840_s3, %s1235_s30 }
  0x2d   : > { %v1236_v16 = vld [vmem:[%s1120_s8 + $0x8] sm:$0xf] (%p1591_p4)  ;;  %v1237_v17 = vld [vmem:[%s1120_s8 + $0x14] sm:$0xf] (%p1591_p4)  ;;  %v1238_v18 = vld [vmem:[%s1120_s8 + $0x20] sm:$0xf] (%p1591_p4) }
  0x2e   : > { %395 = vst [vmem:[%s371_s9] sm:$0xf] (%p1591_p4), %v1236_v16  ;;  %397 = vst [vmem:[%s371_s9 + $0x4] sm:$0xf] (%p1591_p4), %v1237_v17  ;;  %v1239_v19 = vld [vmem:[%s1120_s8 + $0x2c] sm:$0xf] (%p1591_p4) }
  0x2f   : > { %399 = vst [vmem:[%s371_s9 + $0x8] sm:$0xf] (%p1591_p4), %v1238_v18  ;;  %v1240_v20 = vld [vmem:[%s1120_s8 + $0x38] sm:$0xf] (%p1591_p4)  ;;  %v1241_v21 = vld [vmem:[%s1120_s8 + $0x44] sm:$0xf] (%p1591_p4) }
  0x30   : > { %401 = vst [vmem:[%s371_s9 + $0xc] sm:$0xf] %v1239_v19  ;;  %403 = vst [vmem:[%s371_s9 + $0x10] sm:$0xf] %v1240_v20  ;;  %v1242_v22 = vld [vmem:[%s1120_s8 + $0x50] sm:$0xf] }
  0x31   : > { %405 = vst [vmem:[%s371_s9 + $0x14] sm:$0xf] %v1241_v21  ;;  %v1243_v23 = vld [vmem:[%s1120_s8 + $0x5c] sm:$0xf]  ;;  %407 = vst [vmem:[%s371_s9 + $0x18] sm:$0xf] %v1242_v22 }
  0x32   : > { %409 = vst [vmem:[%s371_s9 + $0x1c] sm:$0xf] %v1243_v23 }
  0x33 PF: > { %p1244_p11 = scmp.ge.s32.totalorder %s1520_s20, 1  ;;  %p447_p12 = scmp.lt.s32.totalorder %s1520_s20, 3 }
  0x35   : > { %p448_p13 = pnand %p1244_p11, %p447_p12 }
  0x36   : > { %s1637_s25 = sand.u32 (!%p448_p13), 1, %s1504_s16   ;;  %v1522_v24 = vmov (!%p448_p13), -inf   ;;  %vm738_vm0 = vcmask (!%p448_p13), 523264   ;;  %v1523_v48 = vmov (!%p448_p13), 0.0   ;;  %p511_p0 = scmp.lt.s32.totalorder (!%p448_p13), %s1512_s18, 1 }
  0x37   : > { %451 = sbr.rel (%p448_p13) target bundleno = 721 (0x2d1), region = 147  ;;  %s1640_s10 = sshll.u32 (!%p448_p13), %s1637_s25, 5  ;;  %698 = vmax.xlane.f32.xlu0 (!%p448_p13), %v1522_v24  ;;  %704 = vmax.xlane.f32.xlu1 (!%p448_p13), %v1522_v24 }
  0x38   : > { %s463_s11 = scalar_lea.vmem (!%p448_p13), [#allocation6], %s1640_s10  ;;  %s456_s12 = scalar_lea.vmem (!%p448_p13), [#allocation5], %s1640_s10 }
  0x39   : > { %v1382_v25 = vld [vmem:[%s463_s11] sm:$0xff] (!%p448_p13)   ;;  %v1383_v26 = vld [vmem:[%s463_s11 + $0x8] sm:$0xff] (!%p448_p13)   ;;  %v1384_v28 = vld [vmem:[%s463_s11 + $0x10] sm:$0xff] (!%p448_p13)   ;;  %s470_s13 = scalar_lea.vmem (!%p448_p13), [#allocation7], %s1640_s10  ;;  %s1248_s30 = sshll.u32 (!%p448_p13), %s1637_s25, 6 }
  0x3a   : > { %1290 = vmatprep.subr.bf16.mxu0 (!%p448_p13), %v1382_v25  ;;  %v1386_v27 = vld [vmem:[%s456_s12] sm:$0xff] (!%p448_p13)   ;;  %v1385_v29 = vld [vmem:[%s463_s11 + $0x18] sm:$0xff] (!%p448_p13)   ;;  %v1387_v30 = vld [vmem:[%s456_s12 + $0x8] sm:$0xff] (!%p448_p13)   ;;  %s1767_s5 = scalar_lea.vmem (!%p448_p13), [#allocation8], %s1248_s30  ;;  %s1273_s6 = sshll.u32 (!%p448_p13), %s1512_s18, 10 }
  0x3b   : > { %700 = vmax.xlane.f32.xlu0 (!%p448_p13), %v1522_v24  ;;  %1291 = vmatpush3.bf16.xpose.msra.mxu0 (!%p448_p13), %v1382_v25  ;;  %v1388_v31 = vld [vmem:[%s456_s12 + $0x10] sm:$0xff] (!%p448_p13)   ;;  %v1389_v32 = vld [vmem:[%s456_s12 + $0x18] sm:$0xff] (!%p448_p13)   ;;  %v1390_v50 = vld [vmem:[%s470_s13] sm:$0xff] (!%p448_p13)   ;;  %s1071_s7 = sshll.u32 (!%p448_p13), %s1767_s5, 4  ;;  %s1783_s10 = scalar_lea.hbm (!%p448_p13), %s1841_s4, %s1273_s6  ;;  %s1785_s7 = int_to_ptr.vmem [resolvable:$true] %s1071_s7 }
  0x3c   : > { %708 = vmax.xlane.f32.xlu1 (!%p448_p13), %v1522_v24  ;;  %1292 = vmatprep.subr.bf16.mxu0 (!%p448_p13), %v1383_v26  ;;  %v1391_v51 = vld [vmem:[%s470_s13 + $0x8] sm:$0xff] (!%p448_p13)   ;;  %v1392_v52 = vld [vmem:[%s470_s13 + $0x10] sm:$0xff] (!%p448_p13)   ;;  %v1393_v53 = vld [vmem:[%s470_s13 + $0x18] sm:$0xff] (!%p448_p13)   ;;  %s1442_s11 = scalar_lea.vmem (!%p448_p13), %s1785_s7, 1024  ;;  %s1524_s12 = smov (!%p448_p13), [#allocation8]  }
  0x3d   : > { %1298 = vmatprep.mubr.bf16.mxu0 (!%p448_p13), %v1386_v27  ;;  %1306 = vmatprep.subr.bf16.mxu1 (!%p448_p13), %v1390_v50  ;;  %p1443_p1 = scmp.ne.s32.totalorder (!%p448_p13), %s1785_s7, %s1442_s11  ;;  %s1446_s13 = sshll.u32 (!%p448_p13), %s1524_s12, 4  ;;  %s1447_s13 = int_to_ptr.vmem [resolvable:$false] %s1446_s13 }
  0x3e   : > { %1307 = vmatpush3.bf16.msra.mxu1 %v1390_v50  ;;  %s512_s14 = scalar_select %p511_p0, %s1512_s18, 1 }
  0x3f   : > { %702 = vmax.xlane.f32.xlu0 %v1522_v24  ;;  %1308 = vmatprep.subr.bf16.mxu1 %v1391_v51  ;;  %s1056_s18 = scalar_lea.sflag [#allocation9], %s1637_s25  ;;  %p1444_p2 = pnand %p1443_p1, %p1595_p5 }
  0x40   : > { %s1272_s21 = sshll.u32 %s512_s14, 6  ;;  %s1448_s14 = scalar_lea.vmem %s1447_s13, 2048 }
  0x41   : > { %s1760_s27 = scalar_lea.vmem %s1837_s0, %s1272_s21  ;;  %p1445_p3 = pneg %p1444_p2 }
  0x42   : > { %1309 = vmatpush3.bf16.msra.mxu1 %v1391_v51  ;;  %p1449_p4 = scmp.lt.s32.totalorder %s1785_s7, %s1447_s13  ;;  %p1450_p6 = scmp.lt.s32.totalorder %s1448_s14, %s1442_s11 }
  0x43   : > { %706 = vmax.xlane.f32.xlu0 %v1522_v24  ;;  %1293 = vmatpush3.bf16.xpose.msra.mxu0 %v1383_v26 }
  0x44   : > { %1294 = vmatprep.subr.bf16.mxu0 %v1384_v28  ;;  %1310 = vmatprep.subr.bf16.mxu1 %v1392_v52  ;;  %p1451_p7 = por %p1450_p6, %p1449_p4 }
  0x46   : > { %1311 = vmatpush3.bf16.msra.mxu1 %v1392_v52  ;;  %p1452_p8 = pnand %p1451_p7, %p1445_p3 }
  0x47   : > { %710 = vmax.xlane.f32.xlu0 %v1522_v24  ;;  %1312 = vmatprep.subr.bf16.mxu1 %v1393_v53 }
  0x4a   : > { %1313 = vmatpush3.bf16.msra.mxu1 %v1393_v53 }
  0x4b   : > { %1295 = vmatpush3.bf16.xpose.msra.mxu0 %v1384_v28 }
  0x4c   : > { %1296 = vmatprep.subr.bf16.mxu0 %v1385_v29 }
  0x53   : > { %1297 = vmatpush3.bf16.xpose.msra.mxu0 %v1385_v29 }
  0x5a   : > { %1299 = vmatmul.mubr.bf16.vlgmr.msra.gmra.mrb[0].mxu0 %v1387_v30 }
  0x5b   : > { %1302 = vmatprep.mubr.bf16.mxu0 %v1388_v31 }
  0x62   : > { %1303 = vmatmul.mubr.bf16.gmra.mrb[4].mxu0 %v1389_v32 }
  0xc4   : > { %v1671_v54 = vpop.xlane.xlu0 %698  ;;  %v1679_v58 = vpop.xlane.xlu1 %704 }
  0xc8   : > { %v1673_v55 = vpop.xlane.xlu0 %700 }
  0xc9   : > { %v1683_v60 = vpop.xlane.xlu1 %708 }
  0xcc   : > { %v1675_v56 = vpop.xlane.xlu0 %702 }
  0xd0   : > { %v1677_v57 = vpop.xlane.xlu0 %706 }
  0xd4   : > { %v1681_v59 = vpop.xlane.xlu0 %710 }
 0x12d   : > { %v1300_v33 = vpop.f32.mrb[0].mxu0 }
 0x12e   : > { %v659_v34 = vpop.f32.mrb[1].mxu0  ;;  %v745_v35 = vsel %vm738_vm0, %v1300_v33, -inf }
 0x12f   : > { %746 = vmax.xlane.f32.xlu0 %v745_v35  ;;  %v1645_v36 = vpop.f32.mrb[2].mxu0  ;;  %v739_v37 = vsel %vm738_vm0, %v659_v34, -inf }
 0x130   : > { %740 = vmax.xlane.f32.xlu1 %v739_v37  ;;  %v1648_v38 = vpop.f32.mrb[3].mxu0  ;;  %v748_v39 = vsel %vm738_vm0, %v1645_v36, -inf }
 0x131   : > { %v742_v42 = vsel %vm738_vm0, %v1648_v38, -inf }
 0x134   : > { %749 = vmax.xlane.f32.xlu1 %v748_v39 }
 0x135   : > { %v1652_v40 = vpop.f32.mrb[4].mxu0 }
 0x136   : > { %v1654_v41 = vpop.f32.mrb[5].mxu0  ;;  %v757_v46 = vsel %vm738_vm0, %v1652_v40, -inf }
 0x137   : > { %v751_v43 = vsel %vm738_vm0, %v1654_v41, -inf  ;;  %v1660_v44 = vpop.f32.mrb[6].mxu0 }
 0x138   : > { %743 = vmax.xlane.f32.xlu1 %v742_v42  ;;  %752 = vmax.xlane.f32.xlu0 %v751_v43  ;;  %v1662_v45 = vpop.f32.mrb[7].mxu0  ;;  %v760_v49 = vsel %vm738_vm0, %v1660_v44, -inf }
 0x139   : > { %v754_v47 = vsel %vm738_vm0, %v1662_v45, -inf }
 0x13c   : > { %712 = vmax.xlane.f32.xlu1 %v1522_v24  ;;  %758 = vmax.xlane.f32.xlu0 %v757_v46 }
 0x140   : > { %722 = vmax.xlane.f32.xlu0 %v1523_v48  ;;  %755 = vmax.xlane.f32.xlu1 %v754_v47 }
 0x144   : > { %726 = vmax.xlane.f32.xlu0 %v1523_v48  ;;  %761 = vmax.xlane.f32.xlu1 %v760_v49 }
 0x148   : > { %724 = vmax.xlane.f32.xlu1 %v1523_v48  ;;  %730 = vmax.xlane.f32.xlu0 %v1523_v48 }
 0x14c   : > { %728 = vmax.xlane.f32.xlu1 %v1523_v48  ;;  %734 = vmax.xlane.f32.xlu0 %v1523_v48 }
 0x150   : > { %732 = vmax.xlane.f32.xlu1 %v1523_v48 }
 0x154   : > { %736 = vmax.xlane.f32.xlu1 %v1523_v48 }
 0x1bc   : > { %v747_v61 = vpop.xlane.xlu0 %746 }
 0x1bd   : > { %v1686_v62 = vmax.f32 %v1675_v56, %v747_v61  ;;  %v741_v63 = vpop.xlane.xlu1 %740 }
 0x1be   : > { %v1689_v0 = vmax.f32 %v1671_v54, %v741_v63 }
 0x1bf   : > { %v797_v1 = vsub.f32 %v1300_v33, %v1686_v62 }
 0x1c0   : > { %v795_v2 = vsub.f32 %v659_v34, %v1689_v0 }
 0x1c1   : > { %v807_v3 = vmul.f32 1.442695, %v797_v1  ;;  %v750_v4 = vpop.xlane.xlu1 %749  ;;  %v771_v1 = vsub.f32 %v1671_v54, %v1689_v0 }
 0x1c2   : > { %v803_v5 = vmul.f32 1.442695, %v795_v2  ;;  %v1694_v6 = vmax.f32 %v1679_v58, %v750_v4 }
 0x1c3   : > { %1394 = vpow2.f32 %v807_v3  ;;  %v773_v3 = vsub.f32 %v1675_v56, %v1686_v62 }
 0x1c4   : > { %v798_v7 = vsub.f32 %v1645_v36, %v1694_v6  ;;  %1396 = vpow2.f32 %v803_v5 }
 0x1c5   : > { %v744_v8 = vpop.xlane.xlu1 %743  ;;  %v753_v9 = vpop.xlane.xlu0 %752 }
 0x1c6   : > { %v809_v10 = vmul.f32 1.442695, %v798_v7  ;;  %v1699_v11 = vmax.f32 %v1673_v55, %v744_v8  ;;  %v1702_v12 = vmax.f32 %v1677_v57, %v753_v9  ;;  %v774_v7 = vsub.f32 %v1679_v58, %v1694_v6 }
 0x1c7   : > { %v779_v8 = vmul.f32 1.442695, %v771_v1  ;;  %v783_v9 = vmul.f32 1.442695, %v773_v3 }
 0x1c8   : > { %v796_v13 = vsub.f32 %v1648_v38, %v1699_v11  ;;  %1398 = vpow2.f32 %v809_v10  ;;  %v799_v14 = vsub.f32 %v1654_v41, %v1702_v12  ;;  %v772_v4 = vsub.f32 %v1673_v55, %v1699_v11 }
 0x1c9   : > { %v1708_v15 = vpop.xlane.xlu1 %712  ;;  %v759_v16 = vpop.xlane.xlu0 %758  ;;  %v775_v54 = vsub.f32 %v1677_v57, %v1702_v12 }
 0x1ca   : > { %v805_v17 = vmul.f32 1.442695, %v796_v13  ;;  %v1711_v18 = vmax.f32 %v1681_v59, %v759_v16  ;;  %v811_v19 = vmul.f32 1.442695, %v799_v14  ;;  %v781_v10 = vmul.f32 1.442695, %v772_v4 }
 0x1cb   : > { %v785_v14 = vmul.f32 1.442695, %v774_v7  ;;  %v787_v58 = vmul.f32 1.442695, %v775_v54 }
 0x1cc   : > { %v777_v20 = vsub.f32 %v1681_v59, %v1711_v18  ;;  %v801_v21 = vsub.f32 %v1652_v40, %v1711_v18  ;;  %1400 = vpow2.f32 %v805_v17 }
 0x1cd   : > { %v756_v22 = vpop.xlane.xlu1 %755  ;;  %v1395_v23 = vpop.eup %1394  ;;  %1402 = vpow2.f32 %v811_v19 }
 0x1ce   : > { %v815_v24 = vmul.f32 1.442695, %v801_v21  ;;  %v1718_v25 = vmax.f32 %v1683_v60, %v756_v22  ;;  %v833_v26 = vsel %vm738_vm0, %v1395_v23, 0.0  ;;  %v1397_v27 = vpop.eup %1396  ;;  %v723_v53 = vpop.xlane.xlu0 %722  ;;  %v791_v55 = vmul.f32 1.442695, %v777_v20 }
 0x1cf   : > { %834 = vadd.xlane.f32.xlu0 %v833_v26  ;;  %v827_v34 = vsel %vm738_vm0, %v1397_v27, 0.0 }
 0x1d0   : > { %v776_v28 = vsub.f32 %v1683_v60, %v1718_v25  ;;  %v800_v29 = vsub.f32 %v1662_v45, %v1718_v25  ;;  %1404 = vpow2.f32 %v815_v24 }
 0x1d1   : > { %v762_v30 = vpop.xlane.xlu1 %761 }
 0x1d2   : > { %v813_v31 = vmul.f32 1.442695, %v800_v29  ;;  %v770_v32 = vmax.f32 %v1708_v15, %v762_v30  ;;  %v1399_v33 = vpop.eup %1398  ;;  %v727_v63 = vpop.xlane.xlu0 %726  ;;  %v789_v11 = vmul.f32 1.442695, %v776_v28 }
 0x1d3   : > { %828 = vadd.xlane.f32.xlu0 %v827_v34  ;;  %v836_v37 = vsel %vm738_vm0, %v1399_v33, 0.0  ;;  %v876_v38 = vpack.c.bf16 %v1399_v33, %v1395_v23 }
 0x1d4   : > { %v778_v35 = vsub.f32 %v1708_v15, %v770_v32  ;;  %v802_v36 = vsub.f32 %v1660_v44, %v770_v32  ;;  %1406 = vpow2.f32 %v813_v31  ;;  %837 = vadd.xlane.f32.xlu1 %v836_v37 }
 0x1d5   : > { %v725_v61 = vpop.xlane.xlu1 %724 }
 0x1d6   : > { %v817_v39 = vmul.f32 1.442695, %v802_v36  ;;  %v1401_v40 = vpop.eup %1400  ;;  %v731_v5 = vpop.xlane.xlu0 %730  ;;  %v793_v0 = vmul.f32 1.442695, %v778_v35 }
 0x1d7   : > { %v830_v41 = vsel %vm738_vm0, %v1401_v40, 0.0  ;;  %v875_v42 = vpack.c.bf16 %v1401_v40, %v1397_v27  ;;  %v1403_v43 = vpop.eup %1402 }
 0x1d8   : > { %1408 = vpow2.f32 %v817_v39  ;;  %831 = vadd.xlane.f32.xlu1 %v830_v41  ;;  %v839_v45 = vsel %vm738_vm0, %v1403_v43, 0.0 }
 0x1d9   : > { %1314 = vmatprep.mubr.msk.bf16.mxu1 %vm738_vm0, %v875_v42  ;;  %840 = vadd.xlane.f32.xlu0 %v839_v45  ;;  %v729_v2 = vpop.xlane.xlu1 %728  ;;  %1410 = vpow2.f32 %v779_v8 }
 0x1da   : > { %v1405_v46 = vpop.eup %1404  ;;  %1315 = vmatmul.mubr.msk.bf16.vlgmr.msra.gmra.mrb[0].mxu1 %vm738_vm0, %v876_v38  ;;  %v735_v15 = vpop.xlane.xlu0 %734  ;;  %1412 = vpow2.f32 %v783_v9 }
 0x1db   : > { %v845_v44 = vsel %vm738_vm0, %v1405_v46, 0.0  ;;  %1414 = vpow2.f32 %v781_v10 }
 0x1dc   : > { %1416 = vpow2.f32 %v785_v14 }
 0x1dd   : > { %846 = vadd.xlane.f32.xlu0 %v845_v44  ;;  %v733_v13 = vpop.xlane.xlu1 %732  ;;  %1418 = vpow2.f32 %v791_v55 }
 0x1de   : > { %v1407_v47 = vpop.eup %1406  ;;  %1420 = vpow2.f32 %v787_v58 }
 0x1df   : > { %v842_v48 = vsel %vm738_vm0, %v1407_v47, 0.0  ;;  %v877_v49 = vpack.c.bf16 %v1407_v47, %v1403_v43  ;;  %1422 = vpow2.f32 %v793_v0 }
 0x1e0   : > { %843 = vadd.xlane.f32.xlu1 %v842_v48  ;;  %1424 = vpow2.f32 %v789_v11 }
 0x1e1   : > { %1318 = vmatprep.mubr.msk.bf16.mxu1 %vm738_vm0, %v877_v49  ;;  %v737_v56 = vpop.xlane.xlu1 %736  ;;  %v1025_v49 = vld [vmem:[%s1760_s27 + $0x10] sm:$0xff] }
 0x1e2   : > { %v1409_v50 = vpop.eup %1408 }
 0x1e3   : > { %v848_v51 = vsel %vm738_vm0, %v1409_v50, 0.0  ;;  %v878_v52 = vpack.c.bf16 %v1409_v50, %v1405_v46  ;;  %v1411_v16 = vpop.eup %1410 }
 0x1e4   : > { %849 = vadd.xlane.f32.xlu1 %v848_v51  ;;  %v1413_v19 = vpop.eup %1412  ;;  %v819_v59 = vmul.f32 %v1411_v16, %v723_v53  ;;  %v867_v42 = vmul.f32 0.0, %v1411_v16 }
 0x1e5   : > { %1319 = vmatmul.mubr.msk.bf16.gmra.mrb[4].mxu1 %vm738_vm0, %v878_v52  ;;  %v1415_v57 = vpop.eup %1414  ;;  %v821_v12 = vmul.f32 %v1413_v19, %v727_v63  ;;  %v869_v38 = vmul.f32 0.0, %v1413_v19  ;;  %v1023_v63 = vld [vmem:[%s1760_s27] sm:$0xff] }
 0x1e6   : > { %v1417_v21 = vpop.eup %1416  ;;  %v820_v23 = vmul.f32 %v1415_v57, %v725_v61  ;;  %v868_v52 = vmul.f32 0.0, %v1415_v57 }
 0x1e7   : > { %v822_v18 = vmul.f32 %v1417_v21, %v729_v2  ;;  %v1419_v28 = vpop.eup %1418  ;;  %v870_v44 = vmul.f32 0.0, %v1417_v21 }
 0x1e8   : > { %v1421_v29 = vpop.eup %1420  ;;  %v825_v33 = vmul.f32 %v1419_v28, %v735_v15 }
 0x1e9   : > { %v1423_v30 = vpop.eup %1422  ;;  %v823_v34 = vmul.f32 %v1421_v29, %v731_v5  ;;  %v1026_v5 = vld [vmem:[%s1760_s27 + $0x18] sm:$0xff]  ;;  %v871_v58 = vmul.f32 0.0, %v1421_v29  ;;  %v1028_v29 = vld [vmem:[%s1760_s27 + $0x28] sm:$0xff] }
 0x1ea   : > { %v1425_v32 = vpop.eup %1424  ;;  %v826_v36 = vmul.f32 %v1423_v30, %v737_v56  ;;  %v874_v11 = vmul.f32 0.0, %v1423_v30 }
 0x1eb   : > { %v824_v39 = vmul.f32 %v1425_v32, %v733_v13  ;;  %v1024_v13 = vld [vmem:[%s1760_s27 + $0x8] sm:$0xff] }
 0x25c   : > { %v835_v62 = vpop.xlane.xlu0 %834 }
 0x25d   : > { %v853_v20 = vadd.f32 %v835_v62, %v821_v12  ;;  %v873_v62 = vmul.f32 0.0, %v1419_v28  ;;  %v872_v12 = vmul.f32 0.0, %v1425_v32 }
 0x25f   : > { %1426 = vrcp.f32 %v853_v20 }
 0x260   : > { %v829_v17 = vpop.xlane.xlu0 %828 }
 0x261   : > { %v838_v6 = vpop.xlane.xlu1 %837  ;;  %v851_v60 = vadd.f32 %v829_v17, %v819_v59  ;;  %v1029_v17 = vld [vmem:[%s1760_s27 + $0x30] sm:$0xff] }
 0x262   : > { %v854_v24 = vadd.f32 %v838_v6, %v822_v18  ;;  %v1027_v18 = vld [vmem:[%s1760_s27 + $0x20] sm:$0xff] }
 0x263   : > { %1428 = vrcp.f32 %v851_v60 }
 0x264   : > { %1430 = vrcp.f32 %v854_v24  ;;  %v1030_v24 = vld [vmem:[%s1760_s27 + $0x38] sm:$0xff] }
 0x265   : > { %v832_v22 = vpop.xlane.xlu1 %831 }
 0x266   : > { %v841_v25 = vpop.xlane.xlu0 %840  ;;  %v852_v26 = vadd.f32 %v832_v22, %v820_v23 }
 0x267   : > { %v855_v40 = vadd.f32 %v841_v25, %v823_v34 }
 0x268   : > { %1432 = vrcp.f32 %v852_v26 }
 0x269   : > { %v1427_v47 = vpop.eup %1426 }
 0x26a   : > { %v847_v31 = vpop.xlane.xlu0 %846 }
 0x26b   : > { %v857_v37 = vadd.f32 %v847_v31, %v825_v33 }
 0x26d   : > { %v844_v27 = vpop.xlane.xlu1 %843  ;;  %v1429_v53 = vpop.eup %1428  ;;  %1434 = vrcp.f32 %v857_v37 }
 0x26e   : > { %v856_v48 = vadd.f32 %v844_v27, %v824_v39  ;;  %v1431_v3 = vpop.eup %1430  ;;  %1436 = vrcp.f32 %v855_v40 }
 0x271   : > { %v850_v35 = vpop.xlane.xlu1 %849 }
 0x272   : > { %v858_v43 = vadd.f32 %v850_v35, %v826_v36  ;;  %v1433_v8 = vpop.eup %1432 }
 0x274   : > { %1438 = vrcp.f32 %v858_v43 }
 0x275   : > { %1440 = vrcp.f32 %v856_v48 }
 0x277   : > { %v1435_v16 = vpop.eup %1434 }
 0x278   : > { %v1437_v21 = vpop.eup %1436 }
 0x27e   : > { %v1439_v23 = vpop.eup %1438 }
 0x27f   : > { %v1441_v26 = vpop.eup %1440 }
 0x2ad   : > { %v1316_v41 = vpop.f32.mrb[0].mxu1 }
 0x2ae   : > { %v982_v45 = vadd.f32 %v1316_v41, %v869_v38  ;;  %v949_v46 = vpop.f32.mrb[1].mxu1 }
 0x2af   : > { %v980_v50 = vadd.f32 %v949_v46, %v867_v42  ;;  %v1317_v51 = vpop.f32.mrb[2].mxu1 }
 0x2b0   : > { %v1033_v61 = vmul.f32 %v1427_v47, %v982_v45  ;;  %v983_v1 = vadd.f32 %v1317_v51, %v870_v44  ;;  %v952_v2 = vpop.f32.mrb[3].mxu1 }
 0x2b1   : > { %v1031_v4 = vmul.f32 %v1429_v53, %v980_v50  ;;  %v981_v7 = vadd.f32 %v952_v2, %v868_v52 }
 0x2b2   : > { %v1041_v9 = vadd.f32 %v1033_v61, %v1025_v49  ;;  %v1034_v10 = vmul.f32 %v1431_v3, %v983_v1 }
 0x2b3   : > { %v1039_v14 = vadd.f32 %v1031_v4, %v1023_v63  ;;  %v1032_v15 = vmul.f32 %v1433_v8, %v981_v7 }
 0x2b4   : > { %1049 = vst [vmem:[%s1767_s5 + $0x10] sm:$0xff] %v1041_v9  ;;  %v1042_v54 = vadd.f32 %v1034_v10, %v1026_v5 }
 0x2b5   : > { %1047 = vst [vmem:[%s1767_s5] sm:$0xff] %v1039_v14  ;;  %v1040_v56 = vadd.f32 %v1032_v15, %v1024_v13 }
 0x2b6   : > { %1050 = vst [vmem:[%s1767_s5 + $0x18] sm:$0xff] %v1042_v54 }
 0x2b7   : > { %1048 = vst [vmem:[%s1767_s5 + $0x8] sm:$0xff] %v1040_v56 }
 0x2b8   : > { %v1320_v55 = vpop.f32.mrb[4].mxu1 }
 0x2b9   : > { %v986_v0 = vadd.f32 %v1320_v55, %v873_v62  ;;  %v965_v6 = vpop.f32.mrb[5].mxu1 }
 0x2ba   : > { %v984_v19 = vadd.f32 %v965_v6, %v871_v58  ;;  %v1321_v57 = vpop.f32.mrb[6].mxu1 }
 0x2bb   : > { %v1037_v59 = vmul.f32 %v1435_v16, %v986_v0  ;;  %v987_v20 = vadd.f32 %v1321_v57, %v874_v11  ;;  %v968_v22 = vpop.f32.mrb[7].mxu1 }
 0x2bc   : > { %v1035_v60 = vmul.f32 %v1437_v21, %v984_v19  ;;  %v985_v25 = vadd.f32 %v968_v22, %v872_v12 }
 0x2bd   : > { %v1045_v27 = vadd.f32 %v1037_v59, %v1029_v17  ;;  %v1038_v28 = vmul.f32 %v1439_v23, %v987_v20 }
 0x2be   : > { %v1043_v30 = vadd.f32 %v1035_v60, %v1027_v18  ;;  %v1036_v31 = vmul.f32 %v1441_v26, %v985_v25 }
 0x2bf   : > { %1053 = vst [vmem:[%s1767_s5 + $0x30] sm:$0xff] %v1045_v27  ;;  %v1046_v32 = vadd.f32 %v1038_v28, %v1030_v24 }
 0x2c0   : > { %1051 = vst [vmem:[%s1767_s5 + $0x20] sm:$0xff] %v1043_v30  ;;  %v1044_v33 = vadd.f32 %v1036_v31, %v1028_v29 }
 0x2c1   : > { %1054 = vst [vmem:[%s1767_s5 + $0x38] sm:$0xff] %v1046_v32 }
 0x2c2   : > { %1052 = vst [vmem:[%s1767_s5 + $0x28] sm:$0xff] %v1044_v33 }
 0x2c3   : > { %1455 = shalt.err (!%p1452_p8)
}
 0x2c4   : > { %s1456_s21 = scalar_lea.hbm %s1783_s10, 1024  ;;  %s1460_s27 = scalar_lea.hbm %s1841_s4, 2048 }
 0x2c5   : > { %p1457_p11 = scmp.ne.s32.totalorder %s1783_s10, %s1456_s21  ;;  %p1461_p0 = scmp.lt.u32.totalorder %s1783_s10, %s1841_s4 }
 0x2c6   : > { %p1462_p1 = scmp.lt.u32.totalorder %s1460_s27, %s1456_s21  ;;  %p1464_p3 = scmp.lt.u32.totalorder %s1456_s21, %s1783_s10 }
 0x2c7   : > { %p1458_p12 = pnand %p1457_p11, %p1595_p5 }
 0x2c8   : > { %p1463_p2 = por %p1462_p1, %p1461_p0 }
 0x2c9   : > { %p1459_p13 = pneg %p1458_p12 }
 0x2ca   : > { %p1465_p4 = por %p1464_p3, %p1463_p2 }
 0x2cc   : > { %p1466_p6 = pnand %p1465_p4, %p1459_p13 }
 0x2ce   : > { %1469 = shalt.err (!%p1466_p6)
}
 0x2cf   : > { %s1525_s6 = smov 128   ;;  %s1526_s8 = smov 8  }
 0x2d0   : > { %1323 = dma.vmem_to_hbm [thread:$0]  (%p1595_p5), %s1785_s7, 1024, %s1783_s10, %s1056_s18, %s1525_s6, %s1525_s6, %s1526_s8  }
 0x2d1 PF: > { %s1086_s9 = sand.u32 1, %s1500_s15   ;;  %p1326_p7 = pnand %p1221_p10, %p1606_p9 }
 0x2d2   : > { %s1087_s11 = scalar_lea.sflag [#allocation9], %s1086_s9 }
 0x2d3   : > { %1495 = dma.done.wait (!%p1326_p7), %s1087_s11, 1024  }
 0x2d4   : > { %1497 = vsyncadd (!%p1326_p7), %s1087_s11, 4294966272  ;;  %s17_s20 = sadd.s32 1, %s1520_s20   ;;  %s1845_s15 = smov %s1504_s16 }
 0x2d5   : > { %p14_p8 = scmp.ge.s32.totalorder %s17_s20, 4   ;;  %s1846_s16 = smov %s1508_s17 }
 0x2d6   : > { %s1847_s17 = smov %s1604_s28  ;;  %s1848_s18 = smov %s1516_s19 }
 0x2d7   : > { %s1849_s19 = smov %s1851_s23  ;;  %16 = sbr.rel (!%p14_p8) target bundleno = 4 (0x4), region = 226 }
 0x2de   :  { %1092 = vsyncpa [#allocation9], 1 }
 0x2df   :  { %1094 = vsyncpa [#allocation9 + $0x1], 1 }

</bundles_post_ra>
